<compile_context>
chip_gen: v7x
topology: tpu7x:2x2x1
jax: 0.10.0
libtpu: 0.0.40
codegen_flags: <defaults>
</compile_context>

<pallas_src>
import jax
import jax.numpy as jnp
from jax.experimental import pallas as pl
from jax.experimental.pallas import tpu as pltpu

_LANE = 128


def _abs_kernel(x_ref, o_ref):
    # One VPU op per vreg; the kernel is purely HBM-bandwidth bound.
    o_ref[...] = jnp.abs(x_ref[...])


def _target_block_bytes():
    # ~4 MiB blocks keep v5e/v6e on the flat part of the HBM roofline with a
    # 16 MiB double-buffered VMEM footprint; on v7x (3.2 TB/s HBM) ~8 MiB
    # blocks amortize the ~0.35 us per-grid-step overhead (32 MiB footprint,
    # still < 64 MiB physical VMEM per TensorCore).
    try:
        kind = jax.devices()[0].device_kind.lower()
    except Exception:
        kind = ""
    return (8 << 20) if "v7" in kind else (4 << 20)


def _launch(x2d, rb, grid, vmem_limit):
    rows, cols = x2d.shape
    n = rows * cols
    itemsize = x2d.dtype.itemsize
    return pl.pallas_call(
        _abs_kernel,
        out_shape=jax.ShapeDtypeStruct((rows, cols), x2d.dtype),
        grid=grid,
        in_specs=[pl.BlockSpec((rb, cols), lambda i: (i, 0))],
        out_specs=pl.BlockSpec((rb, cols), lambda i: (i, 0)),
        compiler_params=pltpu.CompilerParams(
            dimension_semantics=("parallel",),
            vmem_limit_bytes=vmem_limit),
        cost_estimate=pl.CostEstimate(
            flops=n, transcendentals=0, bytes_accessed=2 * n * itemsize),
    )(x2d)


def abs_pallas(x):
    """Elementwise absolute value (torch.abs forward) as one Pallas TPU kernel."""
    if x.ndim == 0 or x.size == 0:
        return jnp.abs(x)  # nothing worth a kernel launch

    orig_shape = x.shape
    itemsize = x.dtype.itemsize
    # Packed-sublane alignment: 8 rows (32-bit), 16 (bf16), 32 (int8).
    sub = max(8, 32 // itemsize)
    n = x.size
    target = _target_block_bytes()
    vmem_limit = (48 << 20) if target > (4 << 20) else (32 << 20)

    if n % _LANE == 0:
        # Common path: zero-copy view as a lane-dense (rows, cols) slab so every
        # load/store is an unmasked full-vreg vld/vst.
        cols = _LANE
        for c in (2048, 1024, 512, 256, 128):
            if n % c == 0:
                cols = c
                break
        rows = n // cols
    else:
        # Ragged path: keep the trailing dim, tile leading dims. No pad/slice
        # (those are full extra HBM passes for a bandwidth-bound op).
        cols = orig_shape[-1]
        rows = n // cols
        if sub * cols * itemsize > (16 << 20):
            # TODO(synk): pathologically large odd trailing dim; plain XLA abs.
            return jnp.abs(x)
    x2 = x.reshape(rows, cols)

    # Byte-budget row block: as large as possible while keeping >=4 pipelined
    # grid steps for tensors above ~1 MiB (overlapped DMA + both v7x cores).
    row_bytes = cols * itemsize
    rb = max(sub, (target // row_bytes // sub) * sub)
    if n * itemsize > (1 << 20):
        rb = min(rb, max(sub, (pl.cdiv(rows, 4) // sub) * sub))
    if rb >= rows:
        rb = rows  # single full block (block dims == array dims)
    grid = (pl.cdiv(rows, rb),)  # partial last block is masked by Pallas

    out2 = _launch(x2, rb, grid, vmem_limit)
    return out2.reshape(orig_shape)


if __name__ == "__main__":
    key = jax.random.PRNGKey(0)
    k1, k2, k3 = jax.random.split(key, 3)

    # Shape consistent with a typical module input (batch=2, channels=4, 16x16).
    x = jax.random.normal(k1, (2, 4, 16, 16), jnp.float32)
    out = jax.block_until_ready(abs_pallas(x))
    assert out.shape == x.shape
    assert out.dtype == x.dtype
    assert jnp.array_equal(out, jnp.abs(x))

    # Multi-block path: 4 MiB tensor -> 4 pipelined grid steps of 1 MiB blocks.
    y = jax.random.normal(k2, (1024, 1024), jnp.float32)
    out_y = jax.block_until_ready(abs_pallas(y))
    assert jnp.array_equal(out_y, jnp.abs(y))

    # Ragged path (size not a multiple of 128): single kernel, no pad/slice.
    z = jax.random.normal(k3, (3, 5, 11), jnp.float32)
    out_z = jax.block_until_ready(abs_pallas(z))
    assert jnp.array_equal(out_z, jnp.abs(z))

    print("KERNEL_OK")
</pallas_src>

<mosaic_0001>
module attributes {stable_mosaic.version = 11 : i64} {
  func.func @_abs_kernel(%arg0: i32, %arg1: memref<1x2048xf32, #tpu.memory_space<vmem>>, %arg2: memref<1x2048xf32, #tpu.memory_space<vmem>>) attributes {dimension_semantics = [#tpu.dimension_semantics<parallel>], iteration_bounds = array<i64: 1>, scalar_prefetch = 0 : i64, scratch_operands = 0 : i64, tpu.core_type = #tpu.core_type<tc>, window_params = [{transform_indices = @transform_0, window_bounds = array<i64: 1, 2048>}, {transform_indices = @transform_1, window_bounds = array<i64: 1, 2048>}]} {
    %c0 = arith.constant 0 : index
    %c0_0 = arith.constant 0 : index
    %0 = vector.load %arg1[%c0, %c0_0] : memref<1x2048xf32, #tpu.memory_space<vmem>>, vector<1x2048xf32>
    %1 = math.absf %0 : vector<1x2048xf32>
    %c0_1 = arith.constant 0 : index
    %c0_2 = arith.constant 0 : index
    %2 = vector.load %arg2[%c0_1, %c0_2] : memref<1x2048xf32, #tpu.memory_space<vmem>>, vector<1x2048xf32>
    tpu.vector_store %arg2[%c0_1, %c0_2], %1 {strides = array<i32>} : memref<1x2048xf32, #tpu.memory_space<vmem>>, vector<1x2048xf32>,
    return
  }
  func.func @transform_0(%arg0: i32) -> (i32, i32) {
    %c0_i32 = arith.constant 0 : i32
    %c0_i32_0 = arith.constant 0 : i32
    return %arg0, %c0_i32 : i32, i32
  }
  func.func @transform_1(%arg0: i32) -> (i32, i32) {
    %c0_i32 = arith.constant 0 : i32
    %c0_i32_0 = arith.constant 0 : i32
    return %arg0, %c0_i32 : i32, i32
  }
}

</mosaic_0001>

<bundles_post_ra>
// kernel: tpu_custom_call.1
= control target key start
LH: loop header
LB: loop body
LE: loop exit
PB: predicated region body
PF: predicated region fallthrough
CT: control target
= control target key end

     0   :  { %6 = vsyncpa [#allocation3], 0  ;;  %s128_s0 = inlined_call_operand.hbm [shape: f32[1,2048], index: 0, kind: input, shape index: {}]   ;;  %s129_s1 = inlined_call_operand.hbm [shape: f32[1,2048], index: 1, kind: output, shape index: {}]  }
   0x1   :  { %7 = vsyncpa [#allocation4], 0  ;;  %s92_s6 = smov [#allocation2]   ;;  %s44_s10 = scalar_lea.hbm %s128_s0, 256 }
   0x2   :  { %s14_s7 = sshll.u32 %s92_s6, 4  ;;  %p45_p0 = scmp.ne.s32.totalorder %s128_s0, %s44_s10  ;;  %s15_s7 = int_to_ptr.vmem [resolvable:$true] %s14_s7 }
   0x3   :  { %p48_p1 = scmp.lt.u32.totalorder %s44_s10, %s128_s0 }
   0x5   :  { %p50_p2 = pnand %p48_p1, %p45_p0 }
   0x7   :  { %53 = shalt.err (!%p50_p2)
}
   0x8   :  { %s54_s15 = scalar_lea.vmem %s15_s7, 256  ;;  %p59_p4 = scmp.lt.s32.totalorder %s15_s7, %s15_s7 }
   0x9   :  { %p55_p3 = scmp.ne.s32.totalorder %s15_s7, %s54_s15  ;;  %p60_p5 = scmp.lt.s32.totalorder %s54_s15, %s54_s15 }
   0xb   :  { %p61_p6 = por %p60_p5, %p59_p4 }
   0xd   :  { %p62_p7 = pnand %p61_p6, %p55_p3 }
   0xf   :  { %65 = shalt.err (!%p62_p7)
}
  0x10   :  { %17 = dma.hbm_to_vmem [thread:$0]  %s128_s0, 256, %s15_s7, [#allocation3]  }
  0x11   :  { %88 = dma.done.wait [#allocation3], 256  }
  0x12   :  { %89 = vsyncadd [#allocation3], 4294967040  ;;  %s93_s18 = smov [#allocation5]   ;;  %v21_v0 = vld [vmem:[#allocation2] sm:$0xff]  ;;  %v22_v1 = vld [vmem:[#allocation2 + $0x8] sm:$0xff] }
  0x13   :  { %s33_s19 = sshll.u32 %s93_s18, 4  ;;  %v23_v2 = vand.u32 2147483647, %v21_v0  ;;  %v24_v3 = vand.u32 2147483647, %v22_v1  ;;  %s34_s19 = int_to_ptr.vmem [resolvable:$true] %s33_s19 }
  0x14   :  { %s66_s20 = scalar_lea.vmem %s34_s19, 256  ;;  %p71_p9 = scmp.lt.s32.totalorder %s34_s19, %s34_s19 }
  0x15   :  { %25 = vst [vmem:[#allocation5] sm:$0xff] %v23_v2  ;;  %26 = vst [vmem:[#allocation5 + $0x8] sm:$0xff] %v24_v3  ;;  %p67_p8 = scmp.ne.s32.totalorder %s34_s19, %s66_s20  ;;  %p72_p10 = scmp.lt.s32.totalorder %s66_s20, %s66_s20 }
  0x17   :  { %p73_p11 = por %p72_p10, %p71_p9 }
  0x19   :  { %p74_p12 = pnand %p73_p11, %p67_p8 }
  0x1b   :  { %77 = shalt.err (!%p74_p12)
}
  0x1c   :  { %s78_s22 = scalar_lea.hbm %s129_s1, 256 }
  0x1d   :  { %p79_p13 = scmp.ne.s32.totalorder %s129_s1, %s78_s22  ;;  %p82_p0 = scmp.lt.u32.totalorder %s78_s22, %s129_s1 }
  0x1f   :  { %p84_p1 = pnand %p82_p0, %p79_p13 }
  0x21   :  { %87 = shalt.err (!%p84_p1)
}
  0x22   :  { %36 = dma.vmem_to_hbm [thread:$0]  %s34_s19, 256, %s129_s1, [#allocation4]  }
  0x23   :  { %90 = dma.done.wait [#allocation4], 256  }
  0x24   :  { %91 = vsyncadd [#allocation4], 4294967040 }
  0x25   :  { %40 = vsyncpa [#allocation3], 1 }
  0x26   :  { %41 = vsyncpa [#allocation4], 1 }

</bundles_post_ra>
